<compile_context>
chip_gen: v7x
topology: tpu7x:2x2x1
jax: 0.10.0
libtpu: 0.0.40
codegen_flags: <defaults>
</compile_context>

<pallas_src>
from functools import partial

import jax
import jax.numpy as jnp
from jax.experimental import pallas as pl
from jax.experimental.pallas import tpu as pltpu


def gcn_kernel(x_ref, w1e_ref, w2_ref, c_ref, o_ref, *, compute_dtype):
    # x_ref  : (block_b, S, N)  block of batch elements (original dtype, e.g. f32)
    # w1e_ref: (N, N)           W1^T - I  (compute_dtype)
    # w2_ref : (S, S)           conv2 weight (compute_dtype)
    # c_ref  : (S, N)           rowsum(W2) outer b1 (f32)
    bblk, s, n = x_ref.shape

    # conv1 + residual folded: one (block_b*S, N) x (N, N) MXU matmul, f32 accumulate.
    # The x -> compute_dtype cast happens here on the VPU, hidden under the DMA.
    x2d = x_ref[...].reshape(bblk * s, n).astype(compute_dtype)
    h = jnp.dot(x2d, w1e_ref[...], preferred_element_type=jnp.float32)  # (block_b*S, N) f32

    # conv2 (no bias) over the state axis.  W2 is one stationary (S, S) tile; each
    # batch panel streams against it.  Slices are sublane-aligned (S multiple of 8).
    w2 = w2_ref[...].astype(compute_dtype)
    c = c_ref[...]
    for b in range(bblk):
        hb = h[b * s:(b + 1) * s, :].astype(compute_dtype)              # (S, N)
        ob = jnp.dot(w2, hb, preferred_element_type=jnp.float32)        # (S, N) f32
        o_ref[b] = jnp.maximum(ob + c, 0.0).astype(o_ref.dtype)


def _pick_block_b(B, S, *, target_rows=2048, max_block_b=128):
    # Enough rows in the first matmul to amortize per-step overhead (~0.35us) and
    # fill the MXU, without blowing VMEM.
    bb = max(1, min(max_block_b, target_rows // max(S, 1)))
    if B >= 2:
        # Guarantee grid >= 2 so v7x's two TensorCores both get work (and per-core
        # VMEM pressure halves against its 64 MiB).
        bb = min(bb, pl.cdiv(B, 2))
    return min(bb, B)


@partial(jax.jit, static_argnames=("use_bf16", "out_dtype"))
def gcn_forward(x, w1, b1, w2, *, use_bf16=True, out_dtype=None):
    B, S, N = x.shape
    compute_dtype = jnp.bfloat16 if use_bf16 else jnp.float32
    if out_dtype is None:
        out_dtype = jnp.bfloat16 if use_bf16 else x.dtype

    # ---- offline weight folding (tiny, loop-invariant, done once) ----
    w1_eff = (w1.T - jnp.eye(N, dtype=w1.dtype)).astype(compute_dtype)            # (N, N)
    w2_k = w2.astype(compute_dtype)                                               # (S, S)
    c = (jnp.sum(w2, axis=1, keepdims=True) * b1[None, :]).astype(jnp.float32)    # (S, N)

    block_b = _pick_block_b(B, S)
    B_pad = pl.cdiv(B, block_b) * block_b
    x_in = x if B_pad == B else jnp.pad(x, ((0, B_pad - B), (0, 0), (0, 0)))
    grid = (B_pad // block_b,)

    flops = 2 * B_pad * S * N * N + 2 * B_pad * S * S * N
    bytes_accessed = (
        B_pad * S * N * x_in.dtype.itemsize
        + w1_eff.size * w1_eff.dtype.itemsize
        + w2_k.size * w2_k.dtype.itemsize
        + c.size * c.dtype.itemsize
        + B_pad * S * N * jnp.dtype(out_dtype).itemsize
    )

    out = pl.pallas_call(
        partial(gcn_kernel, compute_dtype=compute_dtype),
        out_shape=jax.ShapeDtypeStruct((B_pad, S, N), out_dtype),
        grid_spec=pltpu.PrefetchScalarGridSpec(
            num_scalar_prefetch=0,
            grid=grid,
            in_specs=[
                pl.BlockSpec((block_b, S, N), lambda b: (b, 0, 0)),  # x block
                pl.BlockSpec((N, N), lambda b: (0, 0)),              # W1^T - I
                pl.BlockSpec((S, S), lambda b: (0, 0)),              # W2
                pl.BlockSpec((S, N), lambda b: (0, 0)),              # C
            ],
            out_specs=pl.BlockSpec((block_b, S, N), lambda b: (b, 0, 0)),
        ),
        compiler_params=pltpu.CompilerParams(
            dimension_semantics=("parallel",),
        ),
        cost_estimate=pl.CostEstimate(
            flops=flops, transcendentals=0, bytes_accessed=bytes_accessed
        ),
    )(x_in, w1_eff, w2_k, c)

    if B_pad != B:
        out = out[:B]
    return out


def gcn_reference(x, w1, b1, w2):
    # Pure-JAX f32 reference of the PyTorch forward.
    h = jnp.einsum("bsm,nm->bsn", x, w1) + b1[None, None, :]
    h = h - x
    out = jnp.einsum("ts,bsn->btn", w2, h)
    return jnp.maximum(out, 0.0)


if __name__ == "__main__":
    B = 2
    num_state = 32   # S (channel dim of the PyTorch input)
    num_node = 128   # N (spatial / length dim of the PyTorch input)

    key = jax.random.PRNGKey(0)
    kx, k1, kb, k2 = jax.random.split(key, 4)

    x = jax.random.normal(kx, (B, num_state, num_node), dtype=jnp.float32)
    # Conv1d(kernel_size=1) weights, squeezed along the kernel axis.
    w1 = jax.random.normal(k1, (num_node, num_node), dtype=jnp.float32) * 0.05
    b1 = jax.random.normal(kb, (num_node,), dtype=jnp.float32) * 0.05
    w2 = jax.random.normal(k2, (num_state, num_state), dtype=jnp.float32) * 0.05

    ref = gcn_reference(x, w1, b1, w2)

    # f32 path: tight check against the PyTorch-equivalent reference.
    out_f32 = jax.block_until_ready(gcn_forward(x, w1, b1, w2, use_bf16=False))
    assert out_f32.shape == (B, num_state, num_node)
    assert out_f32.dtype == jnp.float32
    assert jnp.allclose(out_f32, ref, atol=1e-4, rtol=1e-4), "f32 mismatch vs reference"

    # bf16 MXU path (in-kernel cast, bf16 output, f32 accumulate): loose check.
    out_bf16 = jax.block_until_ready(gcn_forward(x, w1, b1, w2, use_bf16=True))
    assert out_bf16.shape == (B, num_state, num_node)
    assert out_bf16.dtype == jnp.bfloat16
    assert jnp.allclose(out_bf16.astype(jnp.float32), ref, atol=5e-2, rtol=5e-2), \
        "bf16 mismatch vs reference"

    print("KERNEL_OK")
</pallas_src>

<mosaic_0001>
module attributes {stable_mosaic.version = 11 : i64} {
  func.func @gcn_kernel(%arg0: i32, %arg1: memref<1x32x128xf32, #tpu.memory_space<vmem>>, %arg2: memref<128x128xf32, #tpu.memory_space<vmem>>, %arg3: memref<32x32xf32, #tpu.memory_space<vmem>>, %arg4: memref<32x128xf32, #tpu.memory_space<vmem>>, %arg5: memref<1x32x128xf32, #tpu.memory_space<vmem>>) attributes {dimension_semantics = [#tpu.dimension_semantics<parallel>], iteration_bounds = array<i64: 2>, scalar_prefetch = 0 : i64, scratch_operands = 0 : i64, tpu.core_type = #tpu.core_type<tc>, window_params = [{transform_indices = @transform_0, window_bounds = array<i64: 1, 32, 128>}, {pipeline_mode = #tpu.pipeline_mode<synchronous>, transform_indices = @transform_1, window_bounds = array<i64: 128, 128>}, {pipeline_mode = #tpu.pipeline_mode<synchronous>, transform_indices = @transform_2, window_bounds = array<i64: 32, 32>}, {pipeline_mode = #tpu.pipeline_mode<synchronous>, transform_indices = @transform_3, window_bounds = array<i64: 32, 128>}, {transform_indices = @transform_4, window_bounds = array<i64: 1, 32, 128>}]} {
    %c0 = arith.constant 0 : index
    %c0_0 = arith.constant 0 : index
    %c0_1 = arith.constant 0 : index
    %0 = vector.load %arg1[%c0, %c0_0, %c0_1] : memref<1x32x128xf32, #tpu.memory_space<vmem>>, vector<1x32x128xf32>
    %1 = vector.shape_cast %0 : vector<1x32x128xf32> to vector<32x128xf32>
    %c0_2 = arith.constant 0 : index
    %c0_3 = arith.constant 0 : index
    %2 = vector.load %arg2[%c0_2, %c0_3] : memref<128x128xf32, #tpu.memory_space<vmem>>, vector<128x128xf32>
    %cst = arith.constant dense<0.000000e+00> : vector<32x128xf32>
    %3 = tpu.matmul %1, %2, %cst {dimension_numbers = #tpu.dot_dimension_numbers<[1], [0], [0], [1], [0, 0, 1, 1], [], []>} : vector<32x128xf32>, vector<128x128xf32>, vector<32x128xf32> -> vector<32x128xf32>
    %c0_4 = arith.constant 0 : index
    %c0_5 = arith.constant 0 : index
    %4 = vector.load %arg3[%c0_4, %c0_5] : memref<32x32xf32, #tpu.memory_space<vmem>>, vector<32x32xf32>
    %c0_6 = arith.constant 0 : index
    %c0_7 = arith.constant 0 : index
    %5 = vector.load %arg4[%c0_6, %c0_7] : memref<32x128xf32, #tpu.memory_space<vmem>>, vector<32x128xf32>
    %cst_8 = arith.constant dense<0.000000e+00> : vector<32x128xf32>
    %6 = tpu.matmul %4, %3, %cst_8 {dimension_numbers = #tpu.dot_dimension_numbers<[1], [0], [0], [1], [0, 0, 1, 1], [], []>} : vector<32x32xf32>, vector<32x128xf32>, vector<32x128xf32> -> vector<32x128xf32>
    %7 = arith.addf %6, %5 : vector<32x128xf32>
    %cst_9 = arith.constant 0.000000e+00 : f32
    %8 = vector.broadcast %cst_9 : f32 to vector<32x128xf32>
    %9 = arith.maximumf %7, %8 : vector<32x128xf32>
    %c0_10 = arith.constant 0 : index
    %c0_11 = arith.constant 0 : index
    %c0_12 = arith.constant 0 : index
    %10 = vector.load %arg5[%c0_10, %c0_11, %c0_12] : memref<1x32x128xf32, #tpu.memory_space<vmem>>, vector<1x32x128xf32>
    %11 = vector.shape_cast %10 : vector<1x32x128xf32> to vector<32x128xf32>
    %12 = vector.shape_cast %9 : vector<32x128xf32> to vector<1x32x128xf32>
    tpu.vector_store %arg5[%c0_10, %c0_11, %c0_12], %12 {strides = array<i32>} : memref<1x32x128xf32, #tpu.memory_space<vmem>>, vector<1x32x128xf32>,
    return
  }
  func.func @transform_0(%arg0: i32) -> (i32, i32, i32) {
    %c0_i32 = arith.constant 0 : i32
    %c0_i32_0 = arith.constant 0 : i32
    %c0_i32_1 = arith.constant 0 : i32
    return %arg0, %c0_i32, %c0_i32_0 : i32, i32, i32
  }
  func.func @transform_1(%arg0: i32) -> (i32, i32) {
    %c0_i32 = arith.constant 0 : i32
    %c0_i32_0 = arith.constant 0 : i32
    %c0_i32_1 = arith.constant 0 : i32
    return %c0_i32, %c0_i32_0 : i32, i32
  }
  func.func @transform_2(%arg0: i32) -> (i32, i32) {
    %c0_i32 = arith.constant 0 : i32
    %c0_i32_0 = arith.constant 0 : i32
    %c0_i32_1 = arith.constant 0 : i32
    return %c0_i32, %c0_i32_0 : i32, i32
  }
  func.func @transform_3(%arg0: i32) -> (i32, i32) {
    %c0_i32 = arith.constant 0 : i32
    %c0_i32_0 = arith.constant 0 : i32
    %c0_i32_1 = arith.constant 0 : i32
    return %c0_i32, %c0_i32_0 : i32, i32
  }
  func.func @transform_4(%arg0: i32) -> (i32, i32, i32) {
    %c0_i32 = arith.constant 0 : i32
    %c0_i32_0 = arith.constant 0 : i32
    %c0_i32_1 = arith.constant 0 : i32
    return %arg0, %c0_i32, %c0_i32_0 : i32, i32, i32
  }
}

</mosaic_0001>

<bundles_post_ra>
// kernel: gcn_forward.1
= control target key start
LH: loop header
LB: loop body
LE: loop exit
PB: predicated region body
PF: predicated region fallthrough
CT: control target
= control target key end

     0   :  { %9 = vsyncpa [#allocation3], 0  ;;  %s947_s0 = inlined_call_operand.vmem [shape: f32[2,32,128], index: 0, kind: input, shape index: {}]   ;;  %s948_s1 = inlined_call_operand.vmem [shape: f32[128,128], index: 1, kind: input, shape index: {}]   ;;  %s949_s2 = inlined_call_operand.vmem [shape: f32[32,32], index: 2, kind: input, shape index: {}]   ;;  %s950_s3 = inlined_call_operand.vmem [shape: f32[32,128], index: 3, kind: input, shape index: {}]   ;;  %s951_s4 = inlined_call_operand.hbm [shape: f32[2,32,128], index: 4, kind: output, shape index: {}]  }
   0x1   :  { %11 = vsyncpa [#allocation3 + $0x1], 0  ;;  %s762_s15 = smov 0   ;;  %s764_s16 = smov 0  }
   0x2   :  { %s766_s17 = smov 0   ;;  %s768_s18 = smov 0  }
   0x3 LB: > { %s783_s19 = sadd.s32 4294967295, %s732_s18   ;;  %s491_s20 = sadd.s32 4294967294, %s732_s18   ;;  %s732_s18 = sphi %s768_s18, %s957_s18   ;;  %s728_s17 = sphi %s766_s17, %s956_s17   ;;  %s724_s16 = sphi %s764_s16, %s955_s16   ;;  %s720_s15 = sphi %s762_s15, %s954_s15  }
   0x4   : > { %s787_s21 = sadd.s32 1, %s732_s18   ;;  %s113_s22 = sadd.s32 1, %s728_s17 }
   0x5   : > { %s110_s23 = ssub.s32 %s732_s18, %s787_s21  ;;  %p123_p0 = scmp.ne.s32.totalorder %s728_s17, %s724_s16 }
   0x6   : > { %p111_p1 = scmp.eq.s32.totalorder %s110_s23, 0  ;;  %p124_p2 = scmp.eq.s32.totalorder %s783_s19, 1 }
   0x7   : > { %p129_p3 = scmp.ne.s32.totalorder %s724_s16, %s720_s15  ;;  %p130_p4 = scmp.eq.s32.totalorder %s491_s20, 1 }
   0x8   : > { %s798_s24 = scalar_select %p111_p1, %s728_s17, %s113_s22  }
   0x9   : > { %p800_p5 = por %p124_p2, %p123_p0  ;;  %p804_p6 = por %p130_p4, %p129_p3 }
   0xa   : > { %p494_p7 = scmp.ge.s32.totalorder %s732_s18, 1  ;;  %p165_p8 = scmp.lt.s32.totalorder %s732_s18, 3 }
   0xc   : > { %p166_p9 = pnand %p494_p7, %p165_p8 }
   0xd   : > { %v200_v0 = vld [vmem:[%s948_s1] sm:$0xff] (!%p166_p9)  ;;  %v201_v1 = vld [vmem:[%s948_s1 + $0x8] sm:$0xff] (!%p166_p9)  ;;  %v202_v2 = vld [vmem:[%s948_s1 + $0x10] sm:$0xff] (!%p166_p9)  ;;  %p191_p10 = scmp.lt.s32.totalorder (!%p166_p9), %s783_s19, 1  ;;  %vm309_vm0 = vcmask (!%p166_p9), 261120   ;;  %s188_s12 = sand.u32 (!%p166_p9), 1, %s724_s16  }
   0xe   : > { %169 = sbr.rel (%p166_p9) target bundleno = 507 (0x1fb), region = 36  ;;  %v589_v3 = vpack.c.bf16 (!%p166_p9), %v201_v1, %v200_v0  ;;  %v203_v4 = vld [vmem:[%s948_s1 + $0x18] sm:$0xff] (!%p166_p9)  ;;  %v204_v6 = vld [vmem:[%s948_s1 + $0x20] sm:$0xff] (!%p166_p9)  ;;  %v205_v7 = vld [vmem:[%s948_s1 + $0x28] sm:$0xff] (!%p166_p9)  ;;  %s495_s20 = sshll.u32 (!%p166_p9), %s188_s12, 5 }
   0xf   : > { %v593_v5 = vpack.c.bf16 (!%p166_p9), %v203_v4, %v202_v2  ;;  %v597_v8 = vpack.c.bf16 (!%p166_p9), %v205_v7, %v204_v6  ;;  %v206_v9 = vld [vmem:[%s948_s1 + $0x30] sm:$0xff] (!%p166_p9)  ;;  %v207_v10 = vld [vmem:[%s948_s1 + $0x38] sm:$0xff] (!%p166_p9)  ;;  %v208_v13 = vld [vmem:[%s948_s1 + $0x40] sm:$0xff] (!%p166_p9)  ;;  %s190_s6 = scalar_lea.vmem (!%p166_p9), [#allocation2], %s495_s20  ;;  %s508_s7 = sshll.u32 (!%p166_p9), %s783_s19, 9 }
  0x10   : > { %590 = vmatprep.subr.bf16.mxu0 (!%p166_p9), %v589_v3  ;;  %v601_v12 = vpack.c.bf16 (!%p166_p9), %v207_v10, %v206_v9  ;;  %v209_v14 = vld [vmem:[%s948_s1 + $0x48] sm:$0xff] (!%p166_p9)  ;;  %v210_v16 = vld [vmem:[%s948_s1 + $0x50] sm:$0xff] (!%p166_p9)  ;;  %v211_v17 = vld [vmem:[%s948_s1 + $0x58] sm:$0xff] (!%p166_p9)  ;;  %s904_s10 = scalar_lea.hbm (!%p166_p9), %s951_s4, %s508_s7 }
  0x11   : > { %592 = vmatpush3.bf16.msra.mxu0 (!%p166_p9), %v589_v3  ;;  %v605_v15 = vpack.c.bf16 (!%p166_p9), %v209_v14, %v208_v13  ;;  %v609_v18 = vpack.c.bf16 (!%p166_p9), %v211_v17, %v210_v16  ;;  %v212_v19 = vld [vmem:[%s948_s1 + $0x60] sm:$0xff] (!%p166_p9)  ;;  %v213_v20 = vld [vmem:[%s948_s1 + $0x68] sm:$0xff] (!%p166_p9)  ;;  %v214_v22 = vld [vmem:[%s948_s1 + $0x70] sm:$0xff] (!%p166_p9) }
  0x12   : > { %594 = vmatprep.subr.bf16.mxu0 (!%p166_p9), %v593_v5  ;;  %v613_v21 = vpack.c.bf16 (!%p166_p9), %v213_v20, %v212_v19  ;;  %v215_v23 = vld [vmem:[%s948_s1 + $0x78] sm:$0xff] (!%p166_p9)  ;;  %v301_v28 = vld [vmem:[%s949_s2] sm:$0xff] (!%p166_p9)  ;;  %v302_v35 = vld [vmem:[%s949_s2 + $0x8] sm:$0xff] (!%p166_p9) }
  0x13   : > { %v617_v24 = vpack.c.bf16 (!%p166_p9), %v215_v23, %v214_v22  ;;  %583 = vmatprep.mubr.msk.f32.mxu1 (!%p166_p9), %vm309_vm0, %v301_v28  ;;  %v303_v36 = vld [vmem:[%s949_s2 + $0x10] sm:$0xff] (!%p166_p9)  ;;  %v304_v37 = vld [vmem:[%s949_s2 + $0x18] sm:$0xff] (!%p166_p9)  ;;  %v306_v38 = vld [vmem:[%s950_s3 + $0x8] sm:$0xff] (!%p166_p9) }
  0x14   : > { %v305_v39 = vld [vmem:[%s950_s3] sm:$0xff] (!%p166_p9)  ;;  %v308_v44 = vld [vmem:[%s950_s3 + $0x18] sm:$0xff] (!%p166_p9)  ;;  %v307_v46 = vld [vmem:[%s950_s3 + $0x10] sm:$0xff] (!%p166_p9) }
  0x15   : > { %s192_s13 = scalar_select %p191_p10, %s783_s19, 1  ;;  %596 = vmatpush3.bf16.msra.mxu0 %v593_v5 }
  0x16   : > { %598 = vmatprep.subr.bf16.mxu0 %v597_v8  ;;  %s906_s19 = scalar_lea.sflag [#allocation3], %s188_s12 }
  0x17   : > { %s507_s14 = sshll.u32 %s192_s13, 5  ;;  %s734_s13 = smov [#allocation2]  }
  0x18   : > { %s833_s23 = scalar_lea.vmem %s947_s0, %s507_s14  ;;  %s674_s14 = sshll.u32 %s734_s13, 4  ;;  %s675_s14 = int_to_ptr.vmem [resolvable:$false] %s674_s14 }
  0x19   : > { %v196_v11 = vld [vmem:[%s833_s23] sm:$0xff]  ;;  %600 = vmatpush3.bf16.msra.mxu0 %v597_v8  ;;  %v197_v25 = vld [vmem:[%s833_s23 + $0x8] sm:$0xff]  ;;  %v198_v26 = vld [vmem:[%s833_s23 + $0x10] sm:$0xff]  ;;  %s676_s20 = scalar_lea.vmem %s675_s14, 1024 }
  0x1a   : > { %569 = vmatprep.mubr.f32.mxu0 %v196_v11  ;;  %602 = vmatprep.subr.bf16.mxu0 %v601_v12  ;;  %v199_v27 = vld [vmem:[%s833_s23 + $0x18] sm:$0xff]  ;;  %s429_s23 = sshll.u32 %s190_s6, 4  ;;  %s899_s23 = int_to_ptr.vmem [resolvable:$true] %s429_s23 }
  0x1b   : > { %s670_s11 = scalar_lea.vmem %s899_s23, 512  ;;  %p677_p0 = scmp.lt.s32.totalorder %s899_s23, %s675_s14 }
  0x1c   : > { %p671_p11 = scmp.ne.s32.totalorder %s899_s23, %s670_s11  ;;  %p678_p1 = scmp.lt.s32.totalorder %s676_s20, %s670_s11 }
  0x1d   : > { %604 = vmatpush3.bf16.msra.mxu0 %v601_v12 }
  0x1e   : > { %606 = vmatprep.subr.bf16.mxu0 %v605_v15  ;;  %p672_p12 = pnand %p671_p11, %p800_p5  ;;  %p679_p2 = por %p678_p1, %p677_p0 }
  0x20   : > { %p673_p13 = pneg %p672_p12 }
  0x21   : > { %608 = vmatpush3.bf16.msra.mxu0 %v605_v15 }
  0x22   : > { %610 = vmatprep.subr.bf16.mxu0 %v609_v18  ;;  %p680_p3 = pnand %p679_p2, %p673_p13 }
  0x25   : > { %612 = vmatpush3.bf16.msra.mxu0 %v609_v18 }
  0x26   : > { %614 = vmatprep.subr.bf16.mxu0 %v613_v21 }
  0x29   : > { %616 = vmatpush3.bf16.msra.mxu0 %v613_v21 }
  0x2a   : > { %618 = vmatprep.subr.bf16.mxu0 %v617_v24 }
  0x2d   : > { %620 = vmatpush3.bf16.msra.mxu0 %v617_v24 }
  0x30   : > { %570 = vmatmul.mubr.f32.vlgmr.msra.gmra.mrb[0].mxu0 %v197_v25 }
  0x31   : > { %572 = vmatprep.mubr.f32.mxu0 %v198_v26 }
  0x34   : > { %573 = vmatmul.mubr.f32.gmra.mrb[2].mxu0 %v199_v27 }
 0x103   : > { %v571_v29 = vpop.f32.mrb[0].mxu0 }
 0x104   : > { %v282_v30 = vpop.f32.mrb[1].mxu0 }
 0x105   : > { %v621_v31 = vpack.c.bf16 %v571_v29, %v282_v30 }
 0x107   : > { %v574_v32 = vpop.f32.mrb[2].mxu0  ;;  %622 = vmatprep.subr.bf16.mxu1 %v621_v31 }
 0x108   : > { %v292_v33 = vpop.f32.mrb[3].mxu0  ;;  %624 = vmatpush3.bf16.msra.mxu1 %v621_v31 }
 0x109   : > { %v625_v34 = vpack.c.bf16 %v574_v32, %v292_v33 }
 0x10b   : > { %626 = vmatprep.subr.bf16.mxu1 %v625_v34 }
 0x10c   : > { %628 = vmatpush3.bf16.msra.mxu1 %v625_v34 }
 0x10f   : > { %584 = vmatmul.mubr.msk.f32.vlgmr.msra.gmra.mrb[0].mxu1 %vm309_vm0, %v302_v35 }
 0x110   : > { %586 = vmatprep.mubr.msk.f32.mxu1 %vm309_vm0, %v303_v36 }
 0x113   : > { %587 = vmatmul.mubr.msk.f32.gmra.mrb[2].mxu1 %vm309_vm0, %v304_v37 }
 0x1e2   : > { %v585_v40 = vpop.f32.mrb[0].mxu1 }
 0x1e3   : > { %v394_v41 = vadd.f32 %v585_v40, %v306_v38  ;;  %v388_v42 = vpop.f32.mrb[1].mxu1 }
 0x1e4   : > { %v389_v43 = vadd.f32 %v388_v42, %v305_v39 }
 0x1e5   : > { %v408_v45 = vmax.f32 %v394_v41, 0.0 }
 0x1e6   : > { %v407_v47 = vmax.f32 %v389_v43, 0.0  ;;  %v588_v48 = vpop.f32.mrb[2].mxu1 }
 0x1e7   : > { %412 = vst [vmem:[%s190_s6 + $0x8] sm:$0xff] %v408_v45  ;;  %v404_v49 = vadd.f32 %v588_v48, %v308_v44  ;;  %v398_v50 = vpop.f32.mrb[3].mxu1 }
 0x1e8   : > { %411 = vst [vmem:[%s190_s6] sm:$0xff] %v407_v47  ;;  %v399_v51 = vadd.f32 %v398_v50, %v307_v46 }
 0x1e9   : > { %v410_v52 = vmax.f32 %v404_v49, 0.0 }
 0x1ea   : > { %v409_v53 = vmax.f32 %v399_v51, 0.0 }
 0x1eb   : > { %414 = vst [vmem:[%s190_s6 + $0x18] sm:$0xff] %v410_v52 }
 0x1ec   : > { %413 = vst [vmem:[%s190_s6 + $0x10] sm:$0xff] %v409_v53 }
 0x1ed   : > { %683 = shalt.err (!%p680_p3)
}
 0x1ee   : > { %s684_s12 = scalar_lea.hbm %s904_s10, 512  ;;  %s688_s28 = scalar_lea.hbm %s951_s4, 1024 }
 0x1ef   : > { %p685_p4 = scmp.ne.s32.totalorder %s904_s10, %s684_s12  ;;  %p689_p9 = scmp.lt.u32.totalorder %s904_s10, %s951_s4 }
 0x1f0   : > { %p690_p10 = scmp.lt.u32.totalorder %s688_s28, %s684_s12  ;;  %p692_p12 = scmp.lt.u32.totalorder %s684_s12, %s904_s10 }
 0x1f1   : > { %p686_p7 = pnand %p685_p4, %p800_p5 }
 0x1f2   : > { %p691_p11 = por %p690_p10, %p689_p9 }
 0x1f3   : > { %p687_p8 = pneg %p686_p7 }
 0x1f4   : > { %p693_p13 = por %p692_p12, %p691_p11 }
 0x1f6   : > { %p694_p0 = pnand %p693_p13, %p687_p8 }
 0x1f8   : > { %697 = shalt.err (!%p694_p0)
}
 0x1f9   : > { %s735_s5 = smov 128   ;;  %s736_s6 = smov 8  }
 0x1fa   : > { %629 = dma.vmem_to_hbm [thread:$0]  (%p800_p5), %s899_s23, 512, %s904_s10, %s906_s19, %s735_s5, %s735_s5, %s736_s6  }
 0x1fb PF: > { %p635_p1 = scmp.ge.s32.totalorder %s732_s18, 2  ;;  %s444_s7 = sand.u32 1, %s720_s15  }
 0x1fc   : > { %s445_s8 = scalar_lea.sflag [#allocation3], %s444_s7 }
 0x1fd   : > { %p632_p2 = pnand %p635_p1, %p804_p6 }
 0x1ff   : > { %715 = dma.done.wait (!%p632_p2), %s445_s8, 512  }
 0x200   : > { %717 = vsyncadd (!%p632_p2), %s445_s8, 4294966784  ;;  %p14_p3 = scmp.ge.s32.totalorder %s787_s21, 4   ;;  %s954_s15 = smov %s724_s16 }
 0x201   : > { %s955_s16 = smov %s728_s17  ;;  %s956_s17 = smov %s798_s24 }
 0x202   : > { %s957_s18 = smov %s787_s21  ;;  %16 = sbr.rel (!%p14_p3) target bundleno = 3 (0x3), region = 71 }
 0x209   :  { %450 = vsyncpa [#allocation3], 1 }
 0x20a   :  { %452 = vsyncpa [#allocation3 + $0x1], 1 }

</bundles_post_ra>
